<compile_context>
chip_gen: v7x
topology: tpu7x:2x2x1
jax: 0.10.0
libtpu: 0.0.40
codegen_flags: <defaults>
</compile_context>

<pallas_src>
import functools

import jax
import jax.numpy as jnp
from jax.experimental import pallas as pl
from jax.experimental.pallas import tpu as pltpu


def _upsampler_kernel(s_ref, w_ref, b_ref, o_ref):
    # s_ref: (1, 4*C_in, TP)    im2col slab, channel-first, pixels on lanes
    # w_ref: (4*C_out, 4*C_in)  fused phase weights (transposed)
    # b_ref: (4*C_out, 1)       per (phase, channel) bias
    # o_ref: (1, 4*C_out, TP)   phase-packed output, pixels on lanes
    y = jnp.dot(w_ref[...], s_ref[0],
                preferred_element_type=jnp.float32)   # (4*C_out, TP) f32 accumulate
    y = jnp.tanh(y + b_ref[...])                      # lane-dense VPU/EUP epilogue
    o_ref[0] = y.astype(o_ref.dtype)                  # dense, unmasked stores


def _vmem_tile_budget():
    # Generation-aware soft budget for the double-buffered tiles
    # (v5e/v6e: 128 MiB physical VMEM, v7x: 64 MiB).
    try:
        cap = pltpu.get_tpu_info().vmem_capacity_bytes
    except Exception:
        cap = 64 * 1024 * 1024
    return min(cap // 4, 32 * 1024 * 1024)


def _pick_tile_h(N, H, W, c_slab, c_phase, itemsize, vmem_budget_bytes):
    """Largest divisor TH of H whose (double-buffered) in+out tiles fit the budget,
    with a lane-dense TH*W (multiple of 128).  When N == 1, prefer >= 2 h-tiles so
    both v7x TensorCores get work.  Falls back to TH = H (full extent is always a
    legal block) when no lane-dense divisor exists."""
    bytes_per_row = 2 * (c_slab + c_phase) * W * itemsize   # 2x: double buffering
    cap = max(1, vmem_budget_bytes // bytes_per_row)
    dense = [d for d in range(1, H + 1)
             if H % d == 0 and d <= cap and (d * W) % 128 == 0]
    if not dense:
        # TODO(synk): for very large images with awkward W, stream TH-row windows
        # from a pl.ANY HBM ref with pltpu.make_async_copy instead.
        return H
    if N >= 2:
        return max(dense)
    multi = [d for d in dense if H // d >= 2]
    return max(multi) if multi else max(dense)


def upsampler_block(x_nchw, weight, bias, *, mxu_dtype=None):
    """ConvTranspose2d(3, stride=2, padding=1, output_padding=1) + tanh.

    x_nchw : (N, C_in, H, W)
    weight : (C_in, C_out, 3, 3)   -- PyTorch ConvTranspose2d weight layout
    bias   : (C_out,)
    returns: (N, C_out, 2H, 2W)
    """
    N, C_in, H, W = x_nchw.shape
    wc_in, C_out, K, K2 = weight.shape
    assert (wc_in, K, K2) == (C_in, 3, 3)

    # ---- im2col slab, channel-first (XLA glue; kernel stays a clean GEMM) ----
    xp = jnp.pad(x_nchw, ((0, 0), (0, 0), (0, 1), (0, 1)))          # zero halo row/col
    slab = jnp.concatenate(
        [xp[:, :, :H, :W], xp[:, :, :H, 1:],                        # x[p,q],   x[p,q+1]
         xp[:, :, 1:, :W], xp[:, :, 1:, 1:]], axis=1)               # x[p+1,q], x[p+1,q+1]
    slab = slab.reshape(N, 4 * C_in, H * W)                         # pixels on lane axis

    # ---- fused phase weight W4 (4*C_in, 4*C_out), built once ----
    # forward-conv view of the transposed conv: w_flip[kh, kw] = weight[:, :, 2-kh, 2-kw]
    w_flip = jnp.transpose(weight[:, :, ::-1, ::-1], (2, 3, 0, 1))  # (3, 3, C_in, C_out)
    zero = jnp.zeros((C_in, C_out), weight.dtype)

    def row_w(kh):
        # maps [x[r,q], x[r,q+1]] -> [even-col, odd-col] outputs for tap row kh
        top = jnp.concatenate([w_flip[kh, 1], w_flip[kh, 0]], axis=1)   # from x[r, q]
        bot = jnp.concatenate([zero,          w_flip[kh, 2]], axis=1)   # from x[r, q+1]
        return jnp.concatenate([top, bot], axis=0)                      # (2*C_in, 2*C_out)

    w_eo = jnp.concatenate([row_w(1), row_w(0)], axis=1)            # row p   -> even|odd rows
    w_o1 = jnp.concatenate([jnp.zeros((2 * C_in, 2 * C_out), weight.dtype),
                            row_w(2)], axis=1)                      # row p+1 -> odd rows only
    w4 = jnp.concatenate([w_eo, w_o1], axis=0)                      # (4*C_in, 4*C_out)
    w4_t = w4.T                                                     # (4*C_out, 4*C_in)
    b4 = jnp.tile(bias, 4).reshape(4 * C_out, 1)

    if mxu_dtype is not None:                                       # optional bf16 MXU path
        slab = slab.astype(mxu_dtype)
        w4_t = w4_t.astype(mxu_dtype)

    TH = _pick_tile_h(N, H, W, 4 * C_in, 4 * C_out,
                      jnp.dtype(x_nchw.dtype).itemsize, _vmem_tile_budget())
    TP = TH * W                                                     # pixels per tile (lanes)
    grid = (N, H // TH)

    out = pl.pallas_call(
        _upsampler_kernel,
        out_shape=jax.ShapeDtypeStruct((N, 4 * C_out, H * W), x_nchw.dtype),
        grid=grid,
        in_specs=[
            pl.BlockSpec((1, 4 * C_in, TP), lambda n, h: (n, 0, h)),
            pl.BlockSpec((4 * C_out, 4 * C_in), lambda n, h: (0, 0)),
            pl.BlockSpec((4 * C_out, 1), lambda n, h: (0, 0)),
        ],
        out_specs=pl.BlockSpec((1, 4 * C_out, TP), lambda n, h: (n, 0, h)),
        compiler_params=pltpu.CompilerParams(
            dimension_semantics=("parallel", "parallel"),
            vmem_limit_bytes=48 * 1024 * 1024,     # > scoped defaults, < v7x physical
        ),
    )(slab, w4_t, b4)

    # ---- interleave phases + NHWC-free NCHW emission: one fused XLA transpose ----
    out = out.reshape(N, 2, 2, C_out, H, W)                         # (n, a, b, c, p, q)
    out = jnp.transpose(out, (0, 3, 4, 1, 5, 2))                    # (n, c, p, a, q, b)
    return out.reshape(N, C_out, 2 * H, 2 * W)


def _reference(x_nchw, weight, bias):
    """Independent reference via XLA dilated conv (== ConvTranspose2d) + tanh."""
    x = jnp.transpose(x_nchw, (0, 2, 3, 1))                         # NHWC
    w_hwio = jnp.transpose(weight[:, :, ::-1, ::-1], (2, 3, 0, 1))  # flipped, HWIO
    out = jax.lax.conv_general_dilated(
        x, w_hwio,
        window_strides=(1, 1),
        padding=((1, 2), (1, 2)),        # (K-1-p, K-1-p + output_padding)
        lhs_dilation=(2, 2),
        rhs_dilation=(1, 1),
        dimension_numbers=("NHWC", "HWIO", "NHWC"),
    ) + bias.reshape(1, 1, 1, -1)
    return jnp.transpose(jnp.tanh(out), (0, 3, 1, 2))


if __name__ == "__main__":
    key = jax.random.PRNGKey(0)
    k_x, k_w, k_b = jax.random.split(key, 3)

    N, C_in, H, W = 2, 4, 16, 16
    C_out, K = 8, 3

    x = jax.random.normal(k_x, (N, C_in, H, W), dtype=jnp.float32)
    weight = 0.1 * jax.random.normal(k_w, (C_in, C_out, K, K), dtype=jnp.float32)
    bias = 0.1 * jax.random.normal(k_b, (C_out,), dtype=jnp.float32)

    out = jax.block_until_ready(upsampler_block(x, weight, bias))
    ref = jax.block_until_ready(_reference(x, weight, bias))

    assert out.shape == (N, C_out, 2 * H, 2 * W), out.shape
    assert jnp.allclose(out, ref, atol=1e-5, rtol=1e-5)
    print("KERNEL_OK")
</pallas_src>

<mosaic_0001>
module attributes {stable_mosaic.version = 11 : i64} {
  func.func @_upsampler_kernel(%arg0: i32, %arg1: i32, %arg2: memref<1x16x256xf32, #tpu.memory_space<vmem>>, %arg3: memref<32x16xf32, #tpu.memory_space<vmem>>, %arg4: memref<32x1xf32, #tpu.memory_space<vmem>>, %arg5: memref<1x32x256xf32, #tpu.memory_space<vmem>>) attributes {dimension_semantics = [#tpu.dimension_semantics<parallel>, #tpu.dimension_semantics<parallel>], iteration_bounds = array<i64: 2, 1>, scalar_prefetch = 0 : i64, scratch_operands = 0 : i64, tpu.core_type = #tpu.core_type<tc>, window_params = [{transform_indices = @transform_0, window_bounds = array<i64: 1, 16, 256>}, {pipeline_mode = #tpu.pipeline_mode<synchronous>, transform_indices = @transform_1, window_bounds = array<i64: 32, 16>}, {pipeline_mode = #tpu.pipeline_mode<synchronous>, transform_indices = @transform_2, window_bounds = array<i64: 32, 1>}, {transform_indices = @transform_3, window_bounds = array<i64: 1, 32, 256>}]} {
    %c0 = arith.constant 0 : index
    %c0_0 = arith.constant 0 : index
    %0 = vector.load %arg3[%c0, %c0_0] : memref<32x16xf32, #tpu.memory_space<vmem>>, vector<32x16xf32>
    %c0_1 = arith.constant 0 : index
    %c0_2 = arith.constant 0 : index
    %c0_3 = arith.constant 0 : index
    %1 = vector.load %arg2[%c0_1, %c0_2, %c0_3] : memref<1x16x256xf32, #tpu.memory_space<vmem>>, vector<1x16x256xf32>
    %2 = vector.shape_cast %1 : vector<1x16x256xf32> to vector<16x256xf32>
    %cst = arith.constant dense<0.000000e+00> : vector<32x256xf32>
    %3 = tpu.matmul %0, %2, %cst {dimension_numbers = #tpu.dot_dimension_numbers<[1], [0], [0], [1], [0, 0, 1, 1], [], []>} : vector<32x16xf32>, vector<16x256xf32>, vector<32x256xf32> -> vector<32x256xf32>
    %c0_4 = arith.constant 0 : index
    %c0_5 = arith.constant 0 : index
    %4 = vector.load %arg4[%c0_4, %c0_5] : memref<32x1xf32, #tpu.memory_space<vmem>>, vector<32x1xf32>
    %5 = vector.broadcast %4 : vector<32x1xf32> to vector<32x256xf32>
    %6 = arith.addf %3, %5 : vector<32x256xf32>
    %7 = math.tanh %6 : vector<32x256xf32>
    %c0_6 = arith.constant 0 : index
    %c0_7 = arith.constant 0 : index
    %c0_8 = arith.constant 0 : index
    %8 = vector.load %arg5[%c0_6, %c0_7, %c0_8] : memref<1x32x256xf32, #tpu.memory_space<vmem>>, vector<1x32x256xf32>
    %9 = vector.shape_cast %8 : vector<1x32x256xf32> to vector<32x256xf32>
    %10 = vector.shape_cast %7 : vector<32x256xf32> to vector<1x32x256xf32>
    tpu.vector_store %arg5[%c0_6, %c0_7, %c0_8], %10 {strides = array<i32>} : memref<1x32x256xf32, #tpu.memory_space<vmem>>, vector<1x32x256xf32>,
    return
  }
  func.func @transform_0(%arg0: i32, %arg1: i32) -> (i32, i32, i32) {
    %c0_i32 = arith.constant 0 : i32
    %c0_i32_0 = arith.constant 0 : i32
    return %arg0, %c0_i32, %arg1 : i32, i32, i32
  }
  func.func @transform_1(%arg0: i32, %arg1: i32) -> (i32, i32) {
    %c0_i32 = arith.constant 0 : i32
    %c0_i32_0 = arith.constant 0 : i32
    %c0_i32_1 = arith.constant 0 : i32
    return %c0_i32, %c0_i32_0 : i32, i32
  }
  func.func @transform_2(%arg0: i32, %arg1: i32) -> (i32, i32) {
    %c0_i32 = arith.constant 0 : i32
    %c0_i32_0 = arith.constant 0 : i32
    %c0_i32_1 = arith.constant 0 : i32
    return %c0_i32, %c0_i32_0 : i32, i32
  }
  func.func @transform_3(%arg0: i32, %arg1: i32) -> (i32, i32, i32) {
    %c0_i32 = arith.constant 0 : i32
    %c0_i32_0 = arith.constant 0 : i32
    return %arg0, %c0_i32, %arg1 : i32, i32, i32
  }
}

</mosaic_0001>

<bundles_post_ra>
// kernel: tpu_custom_call.1
= control target key start
LH: loop header
LB: loop body
LE: loop exit
PB: predicated region body
PF: predicated region fallthrough
CT: control target
= control target key end

     0   :  { %8 = vsyncpa [#allocation3], 0  ;;  %s795_s0 = inlined_call_operand.vmem [shape: f32[2,16,256], index: 0, kind: input, shape index: {}]   ;;  %s796_s1 = inlined_call_operand.vmem [shape: f32[32,16], index: 1, kind: input, shape index: {}]   ;;  %s797_s2 = inlined_call_operand.vmem [shape: f32[32,1], index: 2, kind: input, shape index: {}]   ;;  %s798_s3 = inlined_call_operand.hbm [shape: f32[2,32,256], index: 3, kind: output, shape index: {}]  }
   0x1   :  { %10 = vsyncpa [#allocation3 + $0x1], 0  ;;  %s652_s12 = smov 0   ;;  %s654_s13 = smov 0  }
   0x2   :  { %s656_s14 = smov 0   ;;  %s658_s15 = smov 0  }
   0x3   :  { %s660_s16 = smov 0   ;;  %s662_s17 = smov 0  }
   0x4 LB: > { %s445_s18 = sadd.s32 4294967295, %s625_s17   ;;  %s446_s19 = sadd.s32 4294967294, %s625_s17   ;;  %s625_s17 = sphi %s662_s17, %s16_s17   ;;  %s621_s16 = sphi %s660_s16, %s805_s16   ;;  %s617_s15 = sphi %s658_s15, %s804_s15   ;;  %s613_s14 = sphi %s656_s14, %s803_s14   ;;  %s609_s13 = sphi %s654_s13, %s802_s13   ;;  %s605_s12 = sphi %s652_s12, %s801_s12  }
   0x5   : > { %s28_s20 = sadd.s32 1, %s621_s16  ;;  %s107_s21 = sadd.s32 1, %s613_s14 }
   0x6   : > { %p30_p0 = scmp.ge.s32.totalorder %s28_s20, 2  ;;  %p117_p1 = scmp.ne.s32.totalorder %s613_s14, %s609_s13 }
   0x7   : > { %p118_p2 = scmp.eq.s32.totalorder %s445_s18, 1  ;;  %p123_p3 = scmp.ne.s32.totalorder %s609_s13, %s605_s12 }
   0x8   : > { %s807_s20 = smov (%p30_p0, %s28_s20), 0  ;;  %p124_p5 = scmp.eq.s32.totalorder %s446_s19, 1 }
   0x9   : > { %p692_p4 = por %p118_p2, %p117_p1  ;;  %s102_s23 = ssub.s32 %s621_s16, %s807_s20 }
   0xa   : > { %p449_p6 = scmp.ge.s32.totalorder %s625_s17, 1  ;;  %p105_p7 = scmp.eq.s32.totalorder %s102_s23, 0 }
   0xb   : > { %p699_p8 = por %p124_p5, %p123_p3  ;;  %p161_p9 = scmp.lt.s32.totalorder %s625_s17, 3 }
   0xc   : > { %s705_s25 = scalar_select %p105_p7, %s613_s14, %s107_s21  }
   0xd   : > { %p162_p10 = pnand %p449_p6, %p161_p9 }
   0xe   : > { %p190_p11 = scmp.lt.s32.totalorder (!%p162_p10), %s617_s15, 1  ;;  %v627_v0 = vmov (!%p162_p10), 0.0   ;;  %v210_v1 = vld [vmem:[%s797_s2 + $0x10] sm:$0xff] (!%p162_p10)  ;;  %v208_v2 = vld [vmem:[%s797_s2] sm:$0xff] (!%p162_p10)  ;;  %v628_v3 = vmov (!%p162_p10), 0   ;;  %v211_v4 = vld [vmem:[%s797_s2 + $0x18] sm:$0xff] (!%p162_p10) }
   0xf   : > { %165 = sbr.rel (%p162_p10) target bundleno = 280 (0x118), region = 32  ;;  %309 = vmatprep.mubr.f32.mxu0 (!%p162_p10), %v627_v0  ;;  %321 = vmatprep.mubr.f32.mxu1 (!%p162_p10), %v627_v0  ;;  %v209_v5 = vld [vmem:[%s797_s2 + $0x8] sm:$0xff] (!%p162_p10)  ;;  %v200_v12 = vld [vmem:[%s796_s1] sm:$0xff] (!%p162_p10)  ;;  %vm232_vm0 = vcmask (!%p162_p10), 130048   ;;  %v202_v13 = vld [vmem:[%s796_s1 + $0x10] sm:$0xff] (!%p162_p10)  ;;  %s463_s6 = sshll.u32 (!%p162_p10), %s617_s15, 10 }
  0x10   : > { %530 = vset.pattern.permute.xlu1 (!%p162_p10), %v628_v3  ;;  %529 = vset.pattern.permute.xlu0 (!%p162_p10), %v628_v3  ;;  %v201_v14 = vld [vmem:[%s796_s1 + $0x8] sm:$0xff] (!%p162_p10)  ;;  %v203_v15 = vld [vmem:[%s796_s1 + $0x18] sm:$0xff] (!%p162_p10)  ;;  %s743_s10 = scalar_lea.hbm (!%p162_p10), %s798_s3, %s463_s6  ;;  %s629_s18 = smov (!%p162_p10), [#allocation2]  }
  0x11   : > { %224 = vperm.xlu1 (!%p162_p10), %530, %v210_v1   ;;  %214 = vperm.xlu0 (!%p162_p10), %529, %v208_v2   ;;  %s551_s19 = sshll.u32 (!%p162_p10), %s629_s18, 4  ;;  %s552_s19 = int_to_ptr.vmem [resolvable:$false] %s551_s19 }
  0x12   : > { %s553_s21 = scalar_lea.vmem (!%p162_p10), %s552_s19, 2048 }
  0x15   : > { %229 = vperm.xlu1 (!%p162_p10), %530, %v211_v4   ;;  %219 = vperm.xlu0 (!%p162_p10), %529, %v209_v5  }
  0x16   : > { %s191_s30 = scalar_select %p190_p11, %s617_s15, 1 }
  0x18   : > { %s462_s4 = sshll.u32 %s191_s30, 5  ;;  %s186_s30 = sand.u32 1, %s609_s13  }
  0x19   : > { %s197_s11 = scalar_lea.vmem %s795_s0, %s462_s4  ;;  %s450_s4 = sshll.u32 %s186_s30, 6 }
  0x1a   : > { %v205_v6 = vld [vmem:[%s197_s11 + $0x8] sm:$0xff]  ;;  %v207_v7 = vld [vmem:[%s197_s11 + $0x18] sm:$0xff]  ;;  %v204_v8 = vld [vmem:[%s197_s11] sm:$0xff]  ;;  %s188_s5 = scalar_lea.vmem [#allocation2], %s450_s4  ;;  %s749_s15 = scalar_lea.sflag [#allocation3], %s186_s30 }
  0x1b   : > { %v464_v9 = vpack.c.bf16 %v207_v7, %v205_v6  ;;  %v206_v10 = vld [vmem:[%s197_s11 + $0x10] sm:$0xff]  ;;  %s366_s7 = sshll.u32 %s188_s5, 4  ;;  %s745_s7 = int_to_ptr.vmem [resolvable:$true] %s366_s7 }
  0x1c   : > { %v466_v11 = vpack.c.bf16 %v206_v10, %v204_v8  ;;  %s547_s11 = scalar_lea.vmem %s745_s7, 1024  ;;  %p554_p1 = scmp.lt.s32.totalorder %s745_s7, %s552_s19 }
  0x1d   : > { %465 = vmatprep.subr.bf16.mxu0 %v464_v9  ;;  %468 = vmatprep.subr.bf16.mxu1 %v464_v9  ;;  %p548_p12 = scmp.ne.s32.totalorder %s745_s7, %s547_s11  ;;  %p555_p2 = scmp.lt.s32.totalorder %s553_s21, %s547_s11 }
  0x1e   : > { %467 = vmatpush1.bf16.msra.mxu0 %v466_v11  ;;  %469 = vmatpush1.bf16.msra.mxu1 %v466_v11 }
  0x1f   : > { %p549_p13 = pnand %p548_p12, %p692_p4  ;;  %p556_p3 = por %p555_p2, %p554_p1 }
  0x21   : > { %453 = vmatmul.mubr.msk.f32.vlgmr.msra.gmra.mrb[0].mxu0 %vm232_vm0, %v200_v12  ;;  %455 = vmatmul.mubr.msk.f32.vlgmr.msra.gmra.mrb[0].mxu1 %vm232_vm0, %v202_v13  ;;  %p550_p0 = pneg %p549_p13 }
  0x22   : > { %315 = vmatprep.mubr.f32.mxu0 %v627_v0  ;;  %327 = vmatprep.mubr.f32.mxu1 %v627_v0 }
  0x23   : > { %p557_p5 = pnand %p556_p3, %p550_p0 }
  0x25   : > { %454 = vmatmul.mubr.msk.f32.gmra.mrb[2].mxu0 %vm232_vm0, %v201_v14  ;;  %456 = vmatmul.mubr.msk.f32.gmra.mrb[2].mxu1 %vm232_vm0, %v203_v15 }
  0x90   : > { %v225_v16 = vpop.permute.xlu1 %224  ;;  %v215_v17 = vpop.permute.xlu0 %214 }
  0x94   : > { %v230_v26 = vpop.permute.xlu1 %229  ;;  %v220_v27 = vpop.permute.xlu0 %219 }
  0xf4   : > { %v311_v18 = vpop.f32.mrb[0].mxu0  ;;  %v323_v19 = vpop.f32.mrb[0].mxu1 }
  0xf5   : > { %v312_v20 = vadd.f32 %v311_v18, %v215_v17  ;;  %v324_v21 = vadd.f32 %v323_v19, %v225_v16  ;;  %v313_v22 = vpop.f32.mrb[1].mxu0  ;;  %v325_v23 = vpop.f32.mrb[1].mxu1 }
  0xf6   : > { %v314_v24 = vadd.f32 %v313_v22, %v215_v17  ;;  %v326_v25 = vadd.f32 %v325_v23, %v225_v16 }
  0xf7   : > { %531 = vtanh.f32 %v312_v20 }
  0xf8   : > { %533 = vtanh.f32 %v324_v21  ;;  %v317_v28 = vpop.f32.mrb[2].mxu0  ;;  %v329_v29 = vpop.f32.mrb[2].mxu1 }
  0xf9   : > { %535 = vtanh.f32 %v314_v24  ;;  %v318_v30 = vadd.f32 %v317_v28, %v220_v27  ;;  %v330_v31 = vadd.f32 %v329_v29, %v230_v26  ;;  %v319_v32 = vpop.f32.mrb[3].mxu0  ;;  %v331_v33 = vpop.f32.mrb[3].mxu1 }
  0xfa   : > { %537 = vtanh.f32 %v326_v25  ;;  %v320_v34 = vadd.f32 %v319_v32, %v220_v27  ;;  %v332_v35 = vadd.f32 %v331_v33, %v230_v26 }
  0xfb   : > { %539 = vtanh.f32 %v318_v30 }
  0xfc   : > { %541 = vtanh.f32 %v330_v31 }
  0xfd   : > { %543 = vtanh.f32 %v320_v34 }
  0xfe   : > { %545 = vtanh.f32 %v332_v35 }
 0x101   : > { %v532_v36 = vpop.eup %531 }
 0x102   : > { %v534_v37 = vpop.eup %533  ;;  %342 = vst [vmem:[%s188_s5] sm:$0xff] %v532_v36 }
 0x103   : > { %v536_v38 = vpop.eup %535  ;;  %346 = vst [vmem:[%s188_s5 + $0x20] sm:$0xff] %v534_v37 }
 0x104   : > { %v538_v39 = vpop.eup %537  ;;  %343 = vst [vmem:[%s188_s5 + $0x8] sm:$0xff] %v536_v38 }
 0x105   : > { %v540_v40 = vpop.eup %539  ;;  %347 = vst [vmem:[%s188_s5 + $0x28] sm:$0xff] %v538_v39 }
 0x106   : > { %v542_v41 = vpop.eup %541  ;;  %344 = vst [vmem:[%s188_s5 + $0x10] sm:$0xff] %v540_v40 }
 0x107   : > { %v544_v42 = vpop.eup %543  ;;  %348 = vst [vmem:[%s188_s5 + $0x30] sm:$0xff] %v542_v41 }
 0x108   : > { %v546_v43 = vpop.eup %545  ;;  %345 = vst [vmem:[%s188_s5 + $0x18] sm:$0xff] %v544_v42 }
 0x109   : > { %349 = vst [vmem:[%s188_s5 + $0x38] sm:$0xff] %v546_v43 }
 0x10a   : > { %560 = shalt.err (!%p557_p5)
}
 0x10b   : > { %s561_s23 = scalar_lea.hbm %s743_s10, 1024  ;;  %s565_s28 = scalar_lea.hbm %s798_s3, 2048 }
 0x10c   : > { %p562_p6 = scmp.ne.s32.totalorder %s743_s10, %s561_s23  ;;  %p566_p10 = scmp.lt.u32.totalorder %s743_s10, %s798_s3 }
 0x10d   : > { %p567_p11 = scmp.lt.u32.totalorder %s565_s28, %s561_s23  ;;  %p569_p13 = scmp.lt.u32.totalorder %s561_s23, %s743_s10 }
 0x10e   : > { %p563_p7 = pnand %p562_p6, %p692_p4 }
 0x10f   : > { %p568_p12 = por %p567_p11, %p566_p10 }
 0x110   : > { %p564_p9 = pneg %p563_p7 }
 0x111   : > { %p570_p0 = por %p569_p13, %p568_p12 }
 0x113   : > { %p571_p1 = pnand %p570_p0, %p564_p9 }
 0x115   : > { %574 = shalt.err (!%p571_p1)
}
 0x116   : > { %s630_s4 = smov 256   ;;  %s631_s5 = smov 16  }
 0x117   : > { %470 = dma.vmem_to_hbm [thread:$0]  (%p692_p4), %s745_s7, 1024, %s743_s10, %s749_s15, %s630_s4, %s630_s4, %s631_s5  }
 0x118 PF: > { %p476_p2 = scmp.ge.s32.totalorder %s625_s17, 2  ;;  %s381_s6 = sand.u32 1, %s605_s12  }
 0x119   : > { %s382_s8 = scalar_lea.sflag [#allocation3], %s381_s6 }
 0x11a   : > { %p473_p3 = pnand %p476_p2, %p699_p8 }
 0x11c   : > { %600 = dma.done.wait (!%p473_p3), %s382_s8, 1024  }
 0x11d   : > { %602 = vsyncadd (!%p473_p3), %s382_s8, 4294966272  ;;  %s16_s17 = sadd.s32 1, %s625_s17   ;;  %s801_s12 = smov %s609_s13 }
 0x11e   : > { %p13_p5 = scmp.ge.s32.totalorder %s16_s17, 4   ;;  %s802_s13 = smov %s613_s14 }
 0x11f   : > { %s803_s14 = smov %s705_s25  ;;  %s804_s15 = smov %s621_s16 }
 0x120   : > { %s805_s16 = smov %s807_s20  ;;  %15 = sbr.rel (!%p13_p5) target bundleno = 4 (0x4), region = 67 }
 0x127   :  { %387 = vsyncpa [#allocation3], 1 }
 0x128   :  { %389 = vsyncpa [#allocation3 + $0x1], 1 }

</bundles_post_ra>
